<compile_context>
chip_gen: v7x
topology: tpu7x:2x2x1
jax: 0.10.0
libtpu: 0.0.40
codegen_flags: <defaults>
</compile_context>

<pallas_src>
import functools

import jax
import jax.numpy as jnp
from jax.experimental import pallas as pl
from jax.experimental.pallas import tpu as pltpu

LANE = 128
SUBLANE = 8


def _cdiv(a, b):
    return (a + b - 1) // b


def _round_up(x, m):
    return ((x + m - 1) // m) * m


def _pad_to(x, shape):
    pads = [(0, s - d) for d, s in zip(x.shape, shape)]
    if all(p == (0, 0) for p in pads):
        return x
    return jnp.pad(x, pads)


def _make_mlp_kernel(num_layers, to_z_p):
    """Kernel closure for a fixed (static) number of hidden layers.

    refs layout:
      z_ref,
      (w_i[bf16], b_i[f32]) * num_layers,
      w_out[bf16] (width 2*to_z_p), b_out[f32],
      eps_ref,
      mu_ref, logsig_ref, zi_ref
    """

    def kernel(*refs):
        z_ref = refs[0]
        idx = 1
        x = z_ref[...]                                   # f32 activations
        for _ in range(num_layers):
            w = refs[idx][...]                           # bf16 weights
            b = refs[idx + 1][...]                       # f32 bias
            idx += 2
            x = jnp.dot(x.astype(jnp.bfloat16), w,
                        preferred_element_type=jnp.float32) + b
            x = jnp.maximum(x, 0.2 * x)                  # LeakyReLU(0.2)

        w_out = refs[idx][...]                           # bf16 (prev_p, 2*to_z_p)
        b_out = refs[idx + 1][...]                       # f32  (1, 2*to_z_p)
        eps = refs[idx + 2][...]
        mu_ref, logsig_ref, zi_ref = refs[idx + 3], refs[idx + 4], refs[idx + 5]

        # Single fused output projection (fills the 256-wide MXU), then a
        # lane-aligned split (to_z_p is a multiple of 128).
        logits = jnp.dot(x.astype(jnp.bfloat16), w_out,
                         preferred_element_type=jnp.float32) + b_out
        mu = logits[:, :to_z_p]
        log_sig = logits[:, to_z_p:]

        mu_ref[...] = mu
        logsig_ref[...] = log_sig
        # rsample: reparameterized Normal sample with std = exp(log_sig).
        zi_ref[...] = mu + jnp.exp(log_sig) * eps

    return kernel


@functools.partial(
    jax.jit, static_argnames=("num_layers", "tile_b", "buffered_weights"))
def netGzi_mlp_forward(z, params_flat, eps, *, num_layers, tile_b=512,
                       buffered_weights=True):
    """params_flat: [w1, b1, ..., wL, bL, w_out, b_out] with weights stored
    pre-transposed as (in_features, out_features) and biases (1, out)."""
    if len(params_flat) != 2 * num_layers + 2:
        raise ValueError("params_flat length does not match num_layers")

    B, in_dim = z.shape
    w_out, b_out = params_flat[-2], params_flat[-1]
    to_z_dim = w_out.shape[1] // 2

    in_p = _round_up(in_dim, LANE)
    to_z_p = _round_up(to_z_dim, LANE)

    # ---- batch tiling: minimize padding, keep >=2 grid steps when the batch
    # allows it (v7x has 2 TensorCores; "parallel" only helps with >=2 steps).
    B8 = _round_up(B, SUBLANE)
    n_steps = max(_cdiv(B8, tile_b), 1)
    if B8 >= 2 * SUBLANE:
        n_steps = max(n_steps, 2)
    tile_b_eff = _round_up(_cdiv(B8, n_steps), SUBLANE)
    Bp = tile_b_eff * _cdiv(B8, tile_b_eff)
    grid = (Bp // tile_b_eff,)

    z_p = _pad_to(z, (Bp, in_p)).astype(jnp.float32)
    eps_p = _pad_to(eps, (Bp, to_z_p)).astype(jnp.float32)

    # ---- lane-pad params; weights bf16 (MXU-native), biases f32.
    padded_params = []
    prev_p = in_p
    for i in range(num_layers):
        w, b = params_flat[2 * i], params_flat[2 * i + 1]
        out_p = _round_up(w.shape[1], LANE)
        padded_params.append(_pad_to(w, (prev_p, out_p)).astype(jnp.bfloat16))
        padded_params.append(_pad_to(b, (1, out_p)).astype(jnp.float32))
        prev_p = out_p

    # Fused output projection: pad the mu-half and log_sig-half separately to
    # to_z_p lanes each and concatenate, so the in-kernel split is lane-aligned.
    w_mu, w_ls = w_out[:, :to_z_dim], w_out[:, to_z_dim:]
    b_mu, b_ls = b_out[:, :to_z_dim], b_out[:, to_z_dim:]
    w_out_p = jnp.concatenate(
        [_pad_to(w_mu, (prev_p, to_z_p)), _pad_to(w_ls, (prev_p, to_z_p))],
        axis=1).astype(jnp.bfloat16)
    b_out_p = jnp.concatenate(
        [_pad_to(b_mu, (1, to_z_p)), _pad_to(b_ls, (1, to_z_p))],
        axis=1).astype(jnp.float32)
    padded_params += [w_out_p, b_out_p]

    kernel = _make_mlp_kernel(num_layers, to_z_p)

    # ---- BlockSpecs: batch-blocked activations, VMEM-resident params with a
    # single pipeline buffer (their block index never changes).
    def const_spec(p):
        kwargs = {}
        if buffered_weights:
            kwargs["pipeline_mode"] = pl.Buffered(1)
        return pl.BlockSpec(p.shape, lambda i: (0, 0), **kwargs)

    in_specs = [pl.BlockSpec((tile_b_eff, in_p), lambda i: (i, 0))]
    in_specs += [const_spec(p) for p in padded_params]
    in_specs.append(pl.BlockSpec((tile_b_eff, to_z_p), lambda i: (i, 0)))

    out_specs = tuple(
        pl.BlockSpec((tile_b_eff, to_z_p), lambda i: (i, 0)) for _ in range(3))
    out_shape = tuple(
        jax.ShapeDtypeStruct((Bp, to_z_p), jnp.float32) for _ in range(3))

    # ---- explicit VMEM budget (resident params + streamed tiles + live acts).
    weight_buf_count = 1 if buffered_weights else 2
    param_bytes = sum(int(p.size) * p.dtype.itemsize for p in padded_params)
    stream_bytes = 2 * 4 * tile_b_eff * (in_p + 4 * to_z_p)  # dbl-buffered I/O
    max_feat = max([in_p, 2 * to_z_p] +
                   [padded_params[2 * i].shape[1] for i in range(num_layers)])
    live_bytes = tile_b_eff * max_feat * 10        # f32 act + bf16 copy + f32 out
    vmem_limit = int(1.4 * (param_bytes * weight_buf_count
                            + stream_bytes + live_bytes)) + (2 << 20)
    vmem_limit = max(vmem_limit, 8 << 20)
    vmem_limit = min(vmem_limit, 64 << 20)         # stay under v7x physical

    # ---- advisory cost estimate.
    flops = 0
    prev = in_p
    for i in range(num_layers):
        outd = padded_params[2 * i].shape[1]
        flops += 2 * Bp * prev * outd
        prev = outd
    flops += 2 * Bp * prev * (2 * to_z_p)
    bytes_accessed = param_bytes + 4 * Bp * (in_p + 4 * to_z_p)
    cost = pl.CostEstimate(flops=int(flops),
                           transcendentals=int(Bp * to_z_p),
                           bytes_accessed=int(bytes_accessed))

    mu_p, logsig_p, zi_p = pl.pallas_call(
        kernel,
        grid=grid,
        out_shape=out_shape,
        in_specs=in_specs,
        out_specs=out_specs,
        compiler_params=pltpu.CompilerParams(
            dimension_semantics=("parallel",),
            vmem_limit_bytes=int(vmem_limit),
        ),
        cost_estimate=cost,
    )(z_p, *padded_params, eps_p)

    return (
        mu_p[:B, :to_z_dim],
        logsig_p[:B, :to_z_dim],
        zi_p[:B, :to_z_dim],
    )


def init_params(key, input_z_dim, to_z_dim, ndf, num_layers):
    """Deterministic init matching nn.Linear shapes (stored transposed)."""
    params = []
    dims_in = input_z_dim
    for _ in range(num_layers):
        key, kw, kb = jax.random.split(key, 3)
        bound = 1.0 / jnp.sqrt(dims_in)
        w = jax.random.uniform(kw, (dims_in, ndf), jnp.float32, -bound, bound)
        b = jax.random.uniform(kb, (1, ndf), jnp.float32, -bound, bound)
        params += [w, b]
        dims_in = ndf
    key, kw, kb = jax.random.split(key, 3)
    bound = 1.0 / jnp.sqrt(dims_in)
    w_out = jax.random.uniform(kw, (dims_in, to_z_dim * 2), jnp.float32,
                               -bound, bound)
    b_out = jax.random.uniform(kb, (1, to_z_dim * 2), jnp.float32,
                               -bound, bound)
    params += [w_out, b_out]
    return params


if __name__ == "__main__":
    # Small shapes consistent with the module's forward (B=16 so the batch
    # grid actually has 2 steps and exercises the "parallel" axis).
    B = 16
    input_z_dim = 16
    to_z_dim = 8
    ndf = 32
    num_layers = 2

    key = jax.random.PRNGKey(0)
    kp, kz, ke = jax.random.split(key, 3)

    params = init_params(kp, input_z_dim, to_z_dim, ndf, num_layers)
    z = jax.random.normal(kz, (B, input_z_dim), jnp.float32)
    eps = jax.random.normal(ke, (B, to_z_dim), jnp.float32)

    def _run(buffered):
        out = netGzi_mlp_forward(z, params, eps, num_layers=num_layers,
                                 buffered_weights=buffered)
        jax.block_until_ready(out)
        return out

    try:
        mu, log_sig, zi = _run(True)
    except Exception:
        # Fallback if this jax build rejects pl.Buffered(1) on constant-index
        # blocks: identical math, default double-buffered weight specs.
        mu, log_sig, zi = _run(False)

    # Pure-JAX reference of the same math (bf16 weights, f32 accumulation).
    x = z
    for i in range(num_layers):
        w = params[2 * i].astype(jnp.bfloat16)
        x = jnp.dot(x.astype(jnp.bfloat16), w,
                    preferred_element_type=jnp.float32) + params[2 * i + 1]
        x = jnp.maximum(x, 0.2 * x)
    w_out_ref = params[-2].astype(jnp.bfloat16)
    logits = jnp.dot(x.astype(jnp.bfloat16), w_out_ref,
                     preferred_element_type=jnp.float32) + params[-1]
    mu_ref, ls_ref = logits[:, :to_z_dim], logits[:, to_z_dim:]
    zi_ref = mu_ref + jnp.exp(ls_ref) * eps

    assert jnp.allclose(mu, mu_ref, atol=2e-3, rtol=2e-3), \
        float(jnp.max(jnp.abs(mu - mu_ref)))
    assert jnp.allclose(log_sig, ls_ref, atol=2e-3, rtol=2e-3), \
        float(jnp.max(jnp.abs(log_sig - ls_ref)))
    assert jnp.allclose(zi, zi_ref, atol=3e-3, rtol=3e-3), \
        float(jnp.max(jnp.abs(zi - zi_ref)))

    print("KERNEL_OK")
</pallas_src>

<mosaic_0001>
module attributes {stable_mosaic.version = 11 : i64} {
  func.func @kernel(%arg0: i32, %arg1: memref<8x128xf32, #tpu.memory_space<vmem>>, %arg2: memref<128x128xbf16, #tpu.memory_space<vmem>>, %arg3: memref<1x128xf32, #tpu.memory_space<vmem>>, %arg4: memref<128x128xbf16, #tpu.memory_space<vmem>>, %arg5: memref<1x128xf32, #tpu.memory_space<vmem>>, %arg6: memref<128x256xbf16, #tpu.memory_space<vmem>>, %arg7: memref<1x256xf32, #tpu.memory_space<vmem>>, %arg8: memref<8x128xf32, #tpu.memory_space<vmem>>, %arg9: memref<8x128xf32, #tpu.memory_space<vmem>>, %arg10: memref<8x128xf32, #tpu.memory_space<vmem>>, %arg11: memref<8x128xf32, #tpu.memory_space<vmem>>) attributes {dimension_semantics = [#tpu.dimension_semantics<parallel>], iteration_bounds = array<i64: 2>, scalar_prefetch = 0 : i64, scratch_operands = 0 : i64, tpu.core_type = #tpu.core_type<tc>, window_params = [{transform_indices = @transform_0, window_bounds = array<i64: 8, 128>}, {pipeline_mode = #tpu.pipeline_mode<synchronous>, transform_indices = @transform_1, window_bounds = array<i64: 128, 128>}, {pipeline_mode = #tpu.pipeline_mode<synchronous>, transform_indices = @transform_2, window_bounds = array<i64: 1, 128>}, {pipeline_mode = #tpu.pipeline_mode<synchronous>, transform_indices = @transform_3, window_bounds = array<i64: 128, 128>}, {pipeline_mode = #tpu.pipeline_mode<synchronous>, transform_indices = @transform_4, window_bounds = array<i64: 1, 128>}, {pipeline_mode = #tpu.pipeline_mode<synchronous>, transform_indices = @transform_5, window_bounds = array<i64: 128, 256>}, {pipeline_mode = #tpu.pipeline_mode<synchronous>, transform_indices = @transform_6, window_bounds = array<i64: 1, 256>}, {transform_indices = @transform_7, window_bounds = array<i64: 8, 128>}, {transform_indices = @transform_8, window_bounds = array<i64: 8, 128>}, {transform_indices = @transform_9, window_bounds = array<i64: 8, 128>}, {transform_indices = @transform_10, window_bounds = array<i64: 8, 128>}]} {
    %c0 = arith.constant 0 : index
    %c0_0 = arith.constant 0 : index
    %0 = vector.load %arg1[%c0, %c0_0] : memref<8x128xf32, #tpu.memory_space<vmem>>, vector<8x128xf32>
    %c0_1 = arith.constant 0 : index
    %c0_2 = arith.constant 0 : index
    %1 = vector.load %arg2[%c0_1, %c0_2] : memref<128x128xbf16, #tpu.memory_space<vmem>>, vector<128x128xbf16>
    %c0_3 = arith.constant 0 : index
    %c0_4 = arith.constant 0 : index
    %2 = vector.load %arg3[%c0_3, %c0_4] : memref<1x128xf32, #tpu.memory_space<vmem>>, vector<1x128xf32>
    %3 = arith.truncf %0 : vector<8x128xf32> to vector<8x128xbf16>
    %cst = arith.constant dense<0.000000e+00> : vector<8x128xf32>
    %4 = tpu.matmul %3, %1, %cst {dimension_numbers = #tpu.dot_dimension_numbers<[1], [0], [0], [1], [0, 0, 1, 1], [], []>} : vector<8x128xbf16>, vector<128x128xbf16>, vector<8x128xf32> -> vector<8x128xf32>
    %5 = vector.broadcast %2 : vector<1x128xf32> to vector<8x128xf32>
    %6 = arith.addf %4, %5 : vector<8x128xf32>
    %cst_5 = arith.constant 2.000000e-01 : f32
    %7 = vector.broadcast %cst_5 : f32 to vector<8x128xf32>
    %8 = arith.mulf %7, %6 : vector<8x128xf32>
    %9 = arith.maximumf %6, %8 : vector<8x128xf32>
    %c0_6 = arith.constant 0 : index
    %c0_7 = arith.constant 0 : index
    %10 = vector.load %arg4[%c0_6, %c0_7] : memref<128x128xbf16, #tpu.memory_space<vmem>>, vector<128x128xbf16>
    %c0_8 = arith.constant 0 : index
    %c0_9 = arith.constant 0 : index
    %11 = vector.load %arg5[%c0_8, %c0_9] : memref<1x128xf32, #tpu.memory_space<vmem>>, vector<1x128xf32>
    %12 = arith.truncf %9 : vector<8x128xf32> to vector<8x128xbf16>
    %cst_10 = arith.constant dense<0.000000e+00> : vector<8x128xf32>
    %13 = tpu.matmul %12, %10, %cst_10 {dimension_numbers = #tpu.dot_dimension_numbers<[1], [0], [0], [1], [0, 0, 1, 1], [], []>} : vector<8x128xbf16>, vector<128x128xbf16>, vector<8x128xf32> -> vector<8x128xf32>
    %14 = vector.broadcast %11 : vector<1x128xf32> to vector<8x128xf32>
    %15 = arith.addf %13, %14 : vector<8x128xf32>
    %cst_11 = arith.constant 2.000000e-01 : f32
    %16 = vector.broadcast %cst_11 : f32 to vector<8x128xf32>
    %17 = arith.mulf %16, %15 : vector<8x128xf32>
    %18 = arith.maximumf %15, %17 : vector<8x128xf32>
    %c0_12 = arith.constant 0 : index
    %c0_13 = arith.constant 0 : index
    %19 = vector.load %arg6[%c0_12, %c0_13] : memref<128x256xbf16, #tpu.memory_space<vmem>>, vector<128x256xbf16>
    %c0_14 = arith.constant 0 : index
    %c0_15 = arith.constant 0 : index
    %20 = vector.load %arg7[%c0_14, %c0_15] : memref<1x256xf32, #tpu.memory_space<vmem>>, vector<1x256xf32>
    %c0_16 = arith.constant 0 : index
    %c0_17 = arith.constant 0 : index
    %21 = vector.load %arg8[%c0_16, %c0_17] : memref<8x128xf32, #tpu.memory_space<vmem>>, vector<8x128xf32>
    %22 = arith.truncf %18 : vector<8x128xf32> to vector<8x128xbf16>
    %cst_18 = arith.constant dense<0.000000e+00> : vector<8x256xf32>
    %23 = tpu.matmul %22, %19, %cst_18 {dimension_numbers = #tpu.dot_dimension_numbers<[1], [0], [0], [1], [0, 0, 1, 1], [], []>} : vector<8x128xbf16>, vector<128x256xbf16>, vector<8x256xf32> -> vector<8x256xf32>
    %24 = vector.broadcast %20 : vector<1x256xf32> to vector<8x256xf32>
    %25 = arith.addf %23, %24 : vector<8x256xf32>
    %26 = vector.extract_strided_slice %25 {offsets = [0, 0], sizes = [8, 128], strides = [1, 1]} : vector<8x256xf32> to vector<8x128xf32>
    %27 = vector.extract_strided_slice %25 {offsets = [0, 128], sizes = [8, 128], strides = [1, 1]} : vector<8x256xf32> to vector<8x128xf32>
    %c0_19 = arith.constant 0 : index
    %c0_20 = arith.constant 0 : index
    %28 = vector.load %arg9[%c0_19, %c0_20] : memref<8x128xf32, #tpu.memory_space<vmem>>, vector<8x128xf32>
    tpu.vector_store %arg9[%c0_19, %c0_20], %26 {strides = array<i32>} : memref<8x128xf32, #tpu.memory_space<vmem>>, vector<8x128xf32>,
    %c0_21 = arith.constant 0 : index
    %c0_22 = arith.constant 0 : index
    %29 = vector.load %arg10[%c0_21, %c0_22] : memref<8x128xf32, #tpu.memory_space<vmem>>, vector<8x128xf32>
    tpu.vector_store %arg10[%c0_21, %c0_22], %27 {strides = array<i32>} : memref<8x128xf32, #tpu.memory_space<vmem>>, vector<8x128xf32>,
    %30 = math.exp %27 : vector<8x128xf32>
    %31 = arith.mulf %30, %21 : vector<8x128xf32>
    %32 = arith.addf %26, %31 : vector<8x128xf32>
    %c0_23 = arith.constant 0 : index
    %c0_24 = arith.constant 0 : index
    %33 = vector.load %arg11[%c0_23, %c0_24] : memref<8x128xf32, #tpu.memory_space<vmem>>, vector<8x128xf32>
    tpu.vector_store %arg11[%c0_23, %c0_24], %32 {strides = array<i32>} : memref<8x128xf32, #tpu.memory_space<vmem>>, vector<8x128xf32>,
    return
  }
  func.func @transform_0(%arg0: i32) -> (i32, i32) {
    %c0_i32 = arith.constant 0 : i32
    %c0_i32_0 = arith.constant 0 : i32
    return %arg0, %c0_i32 : i32, i32
  }
  func.func @transform_1(%arg0: i32) -> (i32, i32) {
    %c0_i32 = arith.constant 0 : i32
    %c0_i32_0 = arith.constant 0 : i32
    %c0_i32_1 = arith.constant 0 : i32
    return %c0_i32, %c0_i32_0 : i32, i32
  }
  func.func @transform_2(%arg0: i32) -> (i32, i32) {
    %c0_i32 = arith.constant 0 : i32
    %c0_i32_0 = arith.constant 0 : i32
    %c0_i32_1 = arith.constant 0 : i32
    return %c0_i32, %c0_i32_0 : i32, i32
  }
  func.func @transform_3(%arg0: i32) -> (i32, i32) {
    %c0_i32 = arith.constant 0 : i32
    %c0_i32_0 = arith.constant 0 : i32
    %c0_i32_1 = arith.constant 0 : i32
    return %c0_i32, %c0_i32_0 : i32, i32
  }
  func.func @transform_4(%arg0: i32) -> (i32, i32) {
    %c0_i32 = arith.constant 0 : i32
    %c0_i32_0 = arith.constant 0 : i32
    %c0_i32_1 = arith.constant 0 : i32
    return %c0_i32, %c0_i32_0 : i32, i32
  }
  func.func @transform_5(%arg0: i32) -> (i32, i32) {
    %c0_i32 = arith.constant 0 : i32
    %c0_i32_0 = arith.constant 0 : i32
    %c0_i32_1 = arith.constant 0 : i32
    return %c0_i32, %c0_i32_0 : i32, i32
  }
  func.func @transform_6(%arg0: i32) -> (i32, i32) {
    %c0_i32 = arith.constant 0 : i32
    %c0_i32_0 = arith.constant 0 : i32
    %c0_i32_1 = arith.constant 0 : i32
    return %c0_i32, %c0_i32_0 : i32, i32
  }
  func.func @transform_7(%arg0: i32) -> (i32, i32) {
    %c0_i32 = arith.constant 0 : i32
    %c0_i32_0 = arith.constant 0 : i32
    return %arg0, %c0_i32 : i32, i32
  }
  func.func @transform_8(%arg0: i32) -> (i32, i32) {
    %c0_i32 = arith.constant 0 : i32
    %c0_i32_0 = arith.constant 0 : i32
    return %arg0, %c0_i32 : i32, i32
  }
  func.func @transform_9(%arg0: i32) -> (i32, i32) {
    %c0_i32 = arith.constant 0 : i32
    %c0_i32_0 = arith.constant 0 : i32
    return %arg0, %c0_i32 : i32, i32
  }
  func.func @transform_10(%arg0: i32) -> (i32, i32) {
    %c0_i32 = arith.constant 0 : i32
    %c0_i32_0 = arith.constant 0 : i32
    return %arg0, %c0_i32 : i32, i32
  }
}

module attributes {stable_mosaic.version = 11 : i64} {
  func.func @kernel(%arg0: i32, %arg1: memref<8x128xf32, #tpu.memory_space<vmem>>, %arg2: memref<128x128xbf16, #tpu.memory_space<vmem>>, %arg3: memref<1x128xf32, #tpu.memory_space<vmem>>, %arg4: memref<128x128xbf16, #tpu.memory_space<vmem>>, %arg5: memref<1x128xf32, #tpu.memory_space<vmem>>, %arg6: memref<128x256xbf16, #tpu.memory_space<vmem>>, %arg7: memref<1x256xf32, #tpu.memory_space<vmem>>, %arg8: memref<8x128xf32, #tpu.memory_space<vmem>>, %arg9: memref<8x128xf32, #tpu.memory_space<vmem>>, %arg10: memref<8x128xf32, #tpu.memory_space<vmem>>, %arg11: memref<8x128xf32, #tpu.memory_space<vmem>>) attributes {dimension_semantics = [#tpu.dimension_semantics<parallel>], iteration_bounds = array<i64: 2>, scalar_prefetch = 0 : i64, scratch_operands = 0 : i64, tpu.core_type = #tpu.core_type<tc>, window_params = [{transform_indices = @transform_0, window_bounds = array<i64: 8, 128>}, {pipeline_mode = #tpu.pipeline_mode<synchronous>, transform_indices = @transform_1, window_bounds = array<i64: 128, 128>}, {pipeline_mode = #tpu.pipeline_mode<synchronous>, transform_indices = @transform_2, window_bounds = array<i64: 1, 128>}, {pipeline_mode = #tpu.pipeline_mode<synchronous>, transform_indices = @transform_3, window_bounds = array<i64: 128, 128>}, {pipeline_mode = #tpu.pipeline_mode<synchronous>, transform_indices = @transform_4, window_bounds = array<i64: 1, 128>}, {pipeline_mode = #tpu.pipeline_mode<synchronous>, transform_indices = @transform_5, window_bounds = array<i64: 128, 256>}, {pipeline_mode = #tpu.pipeline_mode<synchronous>, transform_indices = @transform_6, window_bounds = array<i64: 1, 256>}, {transform_indices = @transform_7, window_bounds = array<i64: 8, 128>}, {transform_indices = @transform_8, window_bounds = array<i64: 8, 128>}, {transform_indices = @transform_9, window_bounds = array<i64: 8, 128>}, {transform_indices = @transform_10, window_bounds = array<i64: 8, 128>}]} {
    %c0 = arith.constant 0 : index
    %c0_0 = arith.constant 0 : index
    %0 = vector.load %arg1[%c0, %c0_0] : memref<8x128xf32, #tpu.memory_space<vmem>>, vector<8x128xf32>
    %c0_1 = arith.constant 0 : index
    %c0_2 = arith.constant 0 : index
    %1 = vector.load %arg2[%c0_1, %c0_2] : memref<128x128xbf16, #tpu.memory_space<vmem>>, vector<128x128xbf16>
    %c0_3 = arith.constant 0 : index
    %c0_4 = arith.constant 0 : index
    %2 = vector.load %arg3[%c0_3, %c0_4] : memref<1x128xf32, #tpu.memory_space<vmem>>, vector<1x128xf32>
    %3 = arith.truncf %0 : vector<8x128xf32> to vector<8x128xbf16>
    %cst = arith.constant dense<0.000000e+00> : vector<8x128xf32>
    %4 = tpu.matmul %3, %1, %cst {dimension_numbers = #tpu.dot_dimension_numbers<[1], [0], [0], [1], [0, 0, 1, 1], [], []>} : vector<8x128xbf16>, vector<128x128xbf16>, vector<8x128xf32> -> vector<8x128xf32>
    %5 = vector.broadcast %2 : vector<1x128xf32> to vector<8x128xf32>
    %6 = arith.addf %4, %5 : vector<8x128xf32>
    %cst_5 = arith.constant 2.000000e-01 : f32
    %7 = vector.broadcast %cst_5 : f32 to vector<8x128xf32>
    %8 = arith.mulf %7, %6 : vector<8x128xf32>
    %9 = arith.maximumf %6, %8 : vector<8x128xf32>
    %c0_6 = arith.constant 0 : index
    %c0_7 = arith.constant 0 : index
    %10 = vector.load %arg4[%c0_6, %c0_7] : memref<128x128xbf16, #tpu.memory_space<vmem>>, vector<128x128xbf16>
    %c0_8 = arith.constant 0 : index
    %c0_9 = arith.constant 0 : index
    %11 = vector.load %arg5[%c0_8, %c0_9] : memref<1x128xf32, #tpu.memory_space<vmem>>, vector<1x128xf32>
    %12 = arith.truncf %9 : vector<8x128xf32> to vector<8x128xbf16>
    %cst_10 = arith.constant dense<0.000000e+00> : vector<8x128xf32>
    %13 = tpu.matmul %12, %10, %cst_10 {dimension_numbers = #tpu.dot_dimension_numbers<[1], [0], [0], [1], [0, 0, 1, 1], [], []>} : vector<8x128xbf16>, vector<128x128xbf16>, vector<8x128xf32> -> vector<8x128xf32>
    %14 = vector.broadcast %11 : vector<1x128xf32> to vector<8x128xf32>
    %15 = arith.addf %13, %14 : vector<8x128xf32>
    %cst_11 = arith.constant 2.000000e-01 : f32
    %16 = vector.broadcast %cst_11 : f32 to vector<8x128xf32>
    %17 = arith.mulf %16, %15 : vector<8x128xf32>
    %18 = arith.maximumf %15, %17 : vector<8x128xf32>
    %c0_12 = arith.constant 0 : index
    %c0_13 = arith.constant 0 : index
    %19 = vector.load %arg6[%c0_12, %c0_13] : memref<128x256xbf16, #tpu.memory_space<vmem>>, vector<128x256xbf16>
    %c0_14 = arith.constant 0 : index
    %c0_15 = arith.constant 0 : index
    %20 = vector.load %arg7[%c0_14, %c0_15] : memref<1x256xf32, #tpu.memory_space<vmem>>, vector<1x256xf32>
    %c0_16 = arith.constant 0 : index
    %c0_17 = arith.constant 0 : index
    %21 = vector.load %arg8[%c0_16, %c0_17] : memref<8x128xf32, #tpu.memory_space<vmem>>, vector<8x128xf32>
    %22 = arith.truncf %18 : vector<8x128xf32> to vector<8x128xbf16>
    %cst_18 = arith.constant dense<0.000000e+00> : vector<8x256xf32>
    %23 = tpu.matmul %22, %19, %cst_18 {dimension_numbers = #tpu.dot_dimension_numbers<[1], [0], [0], [1], [0, 0, 1, 1], [], []>} : vector<8x128xbf16>, vector<128x256xbf16>, vector<8x256xf32> -> vector<8x256xf32>
    %24 = vector.broadcast %20 : vector<1x256xf32> to vector<8x256xf32>
    %25 = arith.addf %23, %24 : vector<8x256xf32>
    %26 = vector.extract_strided_slice %25 {offsets = [0, 0], sizes = [8, 128], strides = [1, 1]} : vector<8x256xf32> to vector<8x128xf32>
    %27 = vector.extract_strided_slice %25 {offsets = [0, 128], sizes = [8, 128], strides = [1, 1]} : vector<8x256xf32> to vector<8x128xf32>
    %c0_19 = arith.constant 0 : index
    %c0_20 = arith.constant 0 : index
    %28 = vector.load %arg9[%c0_19, %c0_20] : memref<8x128xf32, #tpu.memory_space<vmem>>, vector<8x128xf32>
    tpu.vector_store %arg9[%c0_19, %c0_20], %26 {strides = array<i32>} : memref<8x128xf32, #tpu.memory_space<vmem>>, vector<8x128xf32>,
    %c0_21 = arith.constant 0 : index
    %c0_22 = arith.constant 0 : index
    %29 = vector.load %arg10[%c0_21, %c0_22] : memref<8x128xf32, #tpu.memory_space<vmem>>, vector<8x128xf32>
    tpu.vector_store %arg10[%c0_21, %c0_22], %27 {strides = array<i32>} : memref<8x128xf32, #tpu.memory_space<vmem>>, vector<8x128xf32>,
    %30 = math.exp %27 : vector<8x128xf32>
    %31 = arith.mulf %30, %21 : vector<8x128xf32>
    %32 = arith.addf %26, %31 : vector<8x128xf32>
    %c0_23 = arith.constant 0 : index
    %c0_24 = arith.constant 0 : index
    %33 = vector.load %arg11[%c0_23, %c0_24] : memref<8x128xf32, #tpu.memory_space<vmem>>, vector<8x128xf32>
    tpu.vector_store %arg11[%c0_23, %c0_24], %32 {strides = array<i32>} : memref<8x128xf32, #tpu.memory_space<vmem>>, vector<8x128xf32>,
    return
  }
  func.func @transform_0(%arg0: i32) -> (i32, i32) {
    %c0_i32 = arith.constant 0 : i32
    %c0_i32_0 = arith.constant 0 : i32
    return %arg0, %c0_i32 : i32, i32
  }
  func.func @transform_1(%arg0: i32) -> (i32, i32) {
    %c0_i32 = arith.constant 0 : i32
    %c0_i32_0 = arith.constant 0 : i32
    %c0_i32_1 = arith.constant 0 : i32
    return %c0_i32, %c0_i32_0 : i32, i32
  }
  func.func @transform_2(%arg0: i32) -> (i32, i32) {
    %c0_i32 = arith.constant 0 : i32
    %c0_i32_0 = arith.constant 0 : i32
    %c0_i32_1 = arith.constant 0 : i32
    return %c0_i32, %c0_i32_0 : i32, i32
  }
  func.func @transform_3(%arg0: i32) -> (i32, i32) {
    %c0_i32 = arith.constant 0 : i32
    %c0_i32_0 = arith.constant 0 : i32
    %c0_i32_1 = arith.constant 0 : i32
    return %c0_i32, %c0_i32_0 : i32, i32
  }
  func.func @transform_4(%arg0: i32) -> (i32, i32) {
    %c0_i32 = arith.constant 0 : i32
    %c0_i32_0 = arith.constant 0 : i32
    %c0_i32_1 = arith.constant 0 : i32
    return %c0_i32, %c0_i32_0 : i32, i32
  }
  func.func @transform_5(%arg0: i32) -> (i32, i32) {
    %c0_i32 = arith.constant 0 : i32
    %c0_i32_0 = arith.constant 0 : i32
    %c0_i32_1 = arith.constant 0 : i32
    return %c0_i32, %c0_i32_0 : i32, i32
  }
  func.func @transform_6(%arg0: i32) -> (i32, i32) {
    %c0_i32 = arith.constant 0 : i32
    %c0_i32_0 = arith.constant 0 : i32
    %c0_i32_1 = arith.constant 0 : i32
    return %c0_i32, %c0_i32_0 : i32, i32
  }
  func.func @transform_7(%arg0: i32) -> (i32, i32) {
    %c0_i32 = arith.constant 0 : i32
    %c0_i32_0 = arith.constant 0 : i32
    return %arg0, %c0_i32 : i32, i32
  }
  func.func @transform_8(%arg0: i32) -> (i32, i32) {
    %c0_i32 = arith.constant 0 : i32
    %c0_i32_0 = arith.constant 0 : i32
    return %arg0, %c0_i32 : i32, i32
  }
  func.func @transform_9(%arg0: i32) -> (i32, i32) {
    %c0_i32 = arith.constant 0 : i32
    %c0_i32_0 = arith.constant 0 : i32
    return %arg0, %c0_i32 : i32, i32
  }
  func.func @transform_10(%arg0: i32) -> (i32, i32) {
    %c0_i32 = arith.constant 0 : i32
    %c0_i32_0 = arith.constant 0 : i32
    return %arg0, %c0_i32 : i32, i32
  }
}

</mosaic_0001>

<bundles_post_ra>
// kernel: netGzi_mlp_forward.1
= control target key start
LH: loop header
LB: loop body
LE: loop exit
PB: predicated region body
PF: predicated region fallthrough
CT: control target
= control target key end

     0   :  { %s1131_s13 = smov 0   ;;  %s1273_s0 = inlined_call_operand.vmem [shape: f32[16,128], index: 0, kind: input, shape index: {}]   ;;  %s1274_s1 = inlined_call_operand.vmem [shape: bf16[128,128], index: 1, kind: input, shape index: {}]   ;;  %s1275_s2 = inlined_call_operand.vmem [shape: f32[1,128], index: 2, kind: input, shape index: {}]   ;;  %s1276_s3 = inlined_call_operand.vmem [shape: bf16[128,128], index: 3, kind: input, shape index: {}]   ;;  %s1277_s4 = inlined_call_operand.vmem [shape: f32[1,128], index: 4, kind: input, shape index: {}]   ;;  %s1278_s5 = inlined_call_operand.vmem [shape: bf16[128,256], index: 5, kind: input, shape index: {}]   ;;  %s1279_s6 = inlined_call_operand.vmem [shape: f32[1,256], index: 6, kind: input, shape index: {}]   ;;  %s1280_s7 = inlined_call_operand.vmem [shape: f32[16,128], index: 7, kind: input, shape index: {}]   ;;  %s1281_s8 = inlined_call_operand.vmem [shape: f32[16,128], index: 8, kind: output, shape index: {0}]   ;;  %s1282_s9 = inlined_call_operand.vmem [shape: f32[16,128], index: 9, kind: output, shape index: {1}]   ;;  %s1283_s10 = inlined_call_operand.vmem [shape: f32[16,128], index: 10, kind: output, shape index: {2}]  }
   0x1 LB: > { %s908_s14 = sadd.s32 4294967295, %s1071_s13   ;;  %p912_p0 = scmp.ge.s32.totalorder %s1071_s13, 1  ;;  %s1071_s13 = sphi %s1131_s13, %s21_s13  }
   0x2   : > { %p325_p1 = scmp.lt.s32.totalorder %s1071_s13, 3 }
   0x4   : > { %p326_p2 = pnand %p912_p0, %p325_p1 }
   0x5   : > { %v1023_v0 = vld [vmem:[%s1274_s1] sm:$0xff] (!%p326_p2)   ;;  %v1073_v1 = vmov (!%p326_p2), 0.0   ;;  %v1024_v2 = vld [vmem:[%s1274_s1 + $0x8] sm:$0xff] (!%p326_p2)   ;;  %vm1074_vm0 = vmmov (!%p326_p2), 0   ;;  %v1025_v3 = vld [vmem:[%s1274_s1 + $0x10] sm:$0xff] (!%p326_p2)   ;;  %p373_p3 = scmp.lt.s32.totalorder (!%p326_p2), %s908_s14, 1  ;;  %v643_v54 = vlaneseq (!%p326_p2) }
   0x6   : > { %329 = sbr.rel (%p326_p2) target bundleno = 711 (0x2c7), region = 52  ;;  %972 = vmatprep.subr.bf16.mxu0 (!%p326_p2), %v1073_v1  ;;  %992 = vmatprep.subr.bf16.mxu1 (!%p326_p2), %v1073_v1  ;;  %v1031_v4 = vld [vmem:[%s1276_s3] sm:$0xff] (!%p326_p2)   ;;  %v1026_v5 = vld [vmem:[%s1274_s1 + $0x18] sm:$0xff] (!%p326_p2)   ;;  %v1032_v6 = vld [vmem:[%s1276_s3 + $0x8] sm:$0xff] (!%p326_p2)   ;;  %v1075_v44 = vmov (!%p326_p2), 0  }
   0x7   : > { %973 = vmatpush3.bf16.msra.mxu0 (!%p326_p2), %v1023_v0  ;;  %988 = vmatprep.mubr.msk.bf16.mxu0 (!%p326_p2), %vm1074_vm0, %v1073_v1  ;;  %v1027_v7 = vld [vmem:[%s1274_s1 + $0x20] sm:$0xff] (!%p326_p2)   ;;  %v1033_v8 = vld [vmem:[%s1276_s3 + $0x10] sm:$0xff] (!%p326_p2)   ;;  %v1028_v9 = vld [vmem:[%s1274_s1 + $0x28] sm:$0xff] (!%p326_p2)   ;;  %v644_v55 = vshrl.u32 (!%p326_p2), %v643_v54, 7 }
   0x8   : > { %974 = vmatprep.subr.bf16.mxu0 (!%p326_p2), %v1073_v1  ;;  %1008 = vmatprep.mubr.msk.bf16.mxu1 (!%p326_p2), %vm1074_vm0, %v1073_v1  ;;  %v1034_v10 = vld [vmem:[%s1276_s3 + $0x18] sm:$0xff] (!%p326_p2)   ;;  %v1029_v11 = vld [vmem:[%s1274_s1 + $0x30] sm:$0xff] (!%p326_p2)   ;;  %v1035_v12 = vld [vmem:[%s1276_s3 + $0x20] sm:$0xff] (!%p326_p2)  }
   0x9   : > { %993 = vmatpush3.bf16.msra.mxu1 (!%p326_p2), %v1031_v4  ;;  %v1030_v13 = vld [vmem:[%s1274_s1 + $0x38] sm:$0xff] (!%p326_p2)   ;;  %v1036_v15 = vld [vmem:[%s1276_s3 + $0x28] sm:$0xff] (!%p326_p2)   ;;  %v1037_v17 = vld [vmem:[%s1276_s3 + $0x30] sm:$0xff] (!%p326_p2)   ;;  %v645_v56 = vsub.s32 (!%p326_p2), 0, %v644_v55  ;;  %v649_v58 = vsub.s32 (!%p326_p2), 1, %v644_v55 }
   0xa   : > { %994 = vmatprep.subr.bf16.mxu1 (!%p326_p2), %v1073_v1  ;;  %v1038_v18 = vld [vmem:[%s1276_s3 + $0x38] sm:$0xff] (!%p326_p2)   ;;  %v1039_v19 = vld [vmem:[%s1278_s5] ss:$8 sps:$4 sm:$0xff] (!%p326_p2)   ;;  %v1041_v20 = vld [vmem:[%s1278_s5 + $0x4] ss:$8 sps:$4 sm:$0xff] (!%p326_p2)  }
   0xb   : > { %975 = vmatpush3.bf16.msra.mxu0 (!%p326_p2), %v1024_v2  ;;  %v1044_v21 = vld [vmem:[%s1278_s5 + $0x14] ss:$8 sps:$4 sm:$0xff] (!%p326_p2)   ;;  %v1042_v22 = vld [vmem:[%s1278_s5 + $0x10] ss:$8 sps:$4 sm:$0xff] (!%p326_p2)   ;;  %v1047_v23 = vld [vmem:[%s1278_s5 + $0x24] ss:$8 sps:$4 sm:$0xff] (!%p326_p2)  }
   0xc   : > { %976 = vmatprep.subr.bf16.mxu0 (!%p326_p2), %v1073_v1  ;;  %v1045_v24 = vld [vmem:[%s1278_s5 + $0x20] ss:$8 sps:$4 sm:$0xff] (!%p326_p2)   ;;  %v1050_v25 = vld [vmem:[%s1278_s5 + $0x34] ss:$8 sps:$4 sm:$0xff] (!%p326_p2)   ;;  %v1048_v26 = vld [vmem:[%s1278_s5 + $0x30] ss:$8 sps:$4 sm:$0xff] (!%p326_p2)  }
   0xd   : > { %995 = vmatpush3.bf16.msra.mxu1 %v1032_v6  ;;  %s1285_s14 = smov (!%p373_p3, %s908_s14), 1  ;;  %v1053_v27 = vld [vmem:[%s1278_s5 + $0x44] ss:$8 sps:$4 sm:$0xff]   ;;  %v1051_v28 = vld [vmem:[%s1278_s5 + $0x40] ss:$8 sps:$4 sm:$0xff]  }
   0xe   : > { %996 = vmatprep.subr.bf16.mxu1 %v1073_v1  ;;  %s1173_s17 = sshll.u32 %s1285_s14, 3  ;;  %v1056_v29 = vld [vmem:[%s1278_s5 + $0x54] ss:$8 sps:$4 sm:$0xff]   ;;  %v1054_v30 = vld [vmem:[%s1278_s5 + $0x50] ss:$8 sps:$4 sm:$0xff]  }
   0xf   : > { %977 = vmatpush3.bf16.msra.mxu0 %v1025_v3  ;;  %s376_s22 = scalar_lea.vmem %s1273_s0, %s1173_s17  ;;  %v918_v31 = vld [vmem:[%s1275_s2] ss:$0 sm:$0xff]  ;;  %v1059_v40 = vld [vmem:[%s1278_s5 + $0x64] ss:$8 sps:$4 sm:$0xff]   ;;  %v1062_v42 = vld [vmem:[%s1278_s5 + $0x74] ss:$8 sps:$4 sm:$0xff]   ;;  %s384_s19 = scalar_lea.vmem %s1281_s8, %s1173_s17 }
  0x10   : > { %978 = vmatprep.subr.bf16.mxu0 %v1073_v1  ;;  %v394_v14 = vld [vmem:[%s376_s22] sm:$0xff]  ;;  %v1060_v43 = vld [vmem:[%s1278_s5 + $0x70] ss:$8 sps:$4 sm:$0xff]   ;;  %s388_s22 = scalar_lea.vmem %s1282_s9, %s1173_s17  ;;  %s380_s14 = scalar_lea.vmem %s1280_s7, %s1173_s17 }
  0x11   : > { %997 = vmatpush3.bf16.msra.mxu1 %v1033_v8  ;;  %v412_v16 = vpack.c.bf16 %v394_v14, %v394_v14  ;;  %v1057_v41 = vld [vmem:[%s1278_s5 + $0x60] ss:$8 sps:$4 sm:$0xff]   ;;  %s392_s27 = scalar_lea.vmem %s1283_s10, %s1173_s17 }
  0x12   : > { %998 = vmatprep.subr.bf16.mxu1 %v1073_v1  ;;  %v927_v45 = vld [vmem:[%s1277_s4] ss:$0 sm:$0xff] }
  0x13   : > { %979 = vmatpush3.bf16.msra.mxu0 %v1026_v5  ;;  %v639_v57 = vld [vmem:[%s1279_s6] sm:$0x3] }
  0x14   : > { %980 = vmatprep.subr.bf16.mxu0 %v1073_v1  ;;  %v646_v59 = vrot.slane %v639_v57, %v645_v56  ;;  %v650_v60 = vrot.slane %v639_v57, %v649_v58  ;;  %v640_v4 = vld [vmem:[%s380_s14] sm:$0xff] }
  0x15   : > { %999 = vmatpush3.bf16.msra.mxu1 %v1034_v10 }
  0x16   : > { %1000 = vmatprep.subr.bf16.mxu1 %v1073_v1 }
  0x17   : > { %981 = vmatpush3.bf16.msra.mxu0 %v1027_v7 }
  0x18   : > { %982 = vmatprep.subr.bf16.mxu0 %v1073_v1 }
  0x19   : > { %1001 = vmatpush3.bf16.msra.mxu1 %v1035_v12 }
  0x1a   : > { %1002 = vmatprep.subr.bf16.mxu1 %v1073_v1 }
  0x1b   : > { %983 = vmatpush3.bf16.msra.mxu0 %v1028_v9 }
  0x1c   : > { %984 = vmatprep.subr.bf16.mxu0 %v1073_v1 }
  0x1d   : > { %1003 = vmatpush3.bf16.msra.mxu1 %v1036_v15 }
  0x1e   : > { %1004 = vmatprep.subr.bf16.mxu1 %v1073_v1 }
  0x1f   : > { %985 = vmatpush3.bf16.msra.mxu0 %v1029_v11 }
  0x20   : > { %986 = vmatprep.subr.bf16.mxu0 %v1073_v1 }
  0x21   : > { %1005 = vmatpush3.bf16.msra.mxu1 %v1037_v17 }
  0x22   : > { %1006 = vmatprep.subr.bf16.mxu1 %v1073_v1 }
  0x23   : > { %987 = vmatpush3.bf16.msra.mxu0 %v1030_v13 }
  0x24   : > { %733 = vmatprep.subr.bf16.mxu0 %v1041_v20 }
  0x25   : > { %1007 = vmatpush3.bf16.msra.mxu1 %v1038_v18 }
  0x26   : > { %989 = vmatmul.mubr.bf16.vlgmr.msra.gmra.mrb[0].mxu0 %v412_v16 }
  0x27   : > { %734 = vmatpush1.bf16.msra.mxu0 %v1039_v19  ;;  %765 = vmatprep.mubr.bf16.mxu0 %v1075_v44 }
  0x28   : > { %735 = vmatprep.subr.bf16.mxu0 %v1044_v21 }
  0x2b   : > { %736 = vmatpush1.bf16.msra.mxu0 %v1042_v22 }
  0x2c   : > { %737 = vmatprep.subr.bf16.mxu0 %v1047_v23 }
  0x2f   : > { %738 = vmatpush1.bf16.msra.mxu0 %v1045_v24 }
  0x30   : > { %739 = vmatprep.subr.bf16.mxu0 %v1050_v25 }
  0x33   : > { %740 = vmatpush1.bf16.msra.mxu0 %v1048_v26 }
  0x34   : > { %741 = vmatprep.subr.bf16.mxu0 %v1053_v27 }
  0x37   : > { %742 = vmatpush1.bf16.msra.mxu0 %v1051_v28 }
  0x38   : > { %743 = vmatprep.subr.bf16.mxu0 %v1056_v29 }
  0x3b   : > { %744 = vmatpush1.bf16.msra.mxu0 %v1054_v30 }
  0x3c   : > { %745 = vmatprep.subr.bf16.mxu0 %v1059_v40 }
  0x3f   : > { %746 = vmatpush1.bf16.msra.mxu0 %v1057_v41 }
  0x40   : > { %747 = vmatprep.subr.bf16.mxu0 %v1062_v42 }
  0x43   : > { %748 = vmatpush1.bf16.msra.mxu0 %v1060_v43 }
  0xf9   : > { %v501_v32 = vpop.f32.mrb[0].mxu0 }
  0xfa   : > { %v502_v33 = vadd.f32 %v918_v31, %v501_v32  ;;  %v990_v34 = vpop.f32.mrb[1].mxu0 }
  0xfb   : > { %v504_v35 = vpop.f32.mrb[2].mxu0 }
  0xfc   : > { %v507_v36 = vmul.f32 0.2, %v502_v33  ;;  %v991_v37 = vpop.f32.mrb[3].mxu0 }
  0xfe   : > { %v508_v38 = vmax.f32 %v502_v33, %v507_v36 }
 0x100   : > { %v526_v39 = vpack.c.bf16 %v508_v38, %v508_v38 }
 0x102   : > { %1009 = vmatmul.mubr.bf16.vlgmr.msra.gmra.mrb[0].mxu1 %v526_v39 }
 0x1d5   : > { %v615_v46 = vpop.f32.mrb[0].mxu1 }
 0x1d6   : > { %v616_v47 = vadd.f32 %v927_v45, %v615_v46  ;;  %v1010_v48 = vpop.f32.mrb[1].mxu1 }
 0x1d7   : > { %v618_v49 = vpop.f32.mrb[2].mxu1 }
 0x1d8   : > { %v621_v50 = vmul.f32 0.2, %v616_v47  ;;  %v1011_v51 = vpop.f32.mrb[3].mxu1 }
 0x1da   : > { %v622_v52 = vmax.f32 %v616_v47, %v621_v50 }
 0x1dc   : > { %v641_v53 = vpack.c.bf16 %v622_v52, %v622_v52 }
 0x1de   : > { %766 = vmatmul.mubr.bf16.vlgmr.msra.gmra.mrb[4].mxu0 %v641_v53 }
 0x2b1   : > { %v767_v61 = vpop.f32.mrb[4].mxu0 }
 0x2b2   : > { %v768_v62 = vadd.f32 %v767_v61, %v646_v59  ;;  %v769_v63 = vpop.f32.mrb[5].mxu0 }
 0x2b3   : > { %v770_v0 = vadd.f32 %v769_v63, %v650_v60  ;;  %v771_v1 = vpop.f32.mrb[6].mxu0 }
 0x2b4   : > { %774 = vst [vmem:[%s384_s19] sm:$0xff] %v768_v62  ;;  %v772_v2 = vpop.f32.mrb[7].mxu0 }
 0x2b5   : > { %775 = vst [vmem:[%s388_s22] sm:$0xff] %v770_v0  ;;  %v776_v3 = vmul.f32 1.442695, %v770_v0 }
 0x2b7   : > { %1063 = vpow2.f32 %v776_v3 }
 0x2c1   : > { %v1064_v5 = vpop.eup %1063 }
 0x2c2   : > { %v778_v6 = vmul.f32 %v1064_v5, %v640_v4 }
 0x2c4   : > { %v779_v7 = vadd.f32 %v778_v6, %v768_v62 }
 0x2c6   : > { %780 = vst [vmem:[%s392_s27] sm:$0xff] %v779_v7 }
 0x2c7 PF: > { %s21_s13 = sadd.s32 1, %s1071_s13  }
 0x2c8   : > { %p18_p4 = scmp.ge.s32.totalorder %s21_s13, 4  }
 0x2ca   :  { %20 = sbr.rel (!%p18_p4) target bundleno = 1 (0x1), region = 109 }

// kernel: netGzi_mlp_forward.1
= control target key start
LH: loop header
LB: loop body
LE: loop exit
PB: predicated region body
PF: predicated region fallthrough
CT: control target
= control target key end

     0   :  { %s1131_s13 = smov 0   ;;  %s1273_s0 = inlined_call_operand.vmem [shape: f32[16,128], index: 0, kind: input, shape index: {}]   ;;  %s1274_s1 = inlined_call_operand.vmem [shape: bf16[128,128], index: 1, kind: input, shape index: {}]   ;;  %s1275_s2 = inlined_call_operand.vmem [shape: f32[1,128], index: 2, kind: input, shape index: {}]   ;;  %s1276_s3 = inlined_call_operand.vmem [shape: bf16[128,128], index: 3, kind: input, shape index: {}]   ;;  %s1277_s4 = inlined_call_operand.vmem [shape: f32[1,128], index: 4, kind: input, shape index: {}]   ;;  %s1278_s5 = inlined_call_operand.vmem [shape: bf16[128,256], index: 5, kind: input, shape index: {}]   ;;  %s1279_s6 = inlined_call_operand.vmem [shape: f32[1,256], index: 6, kind: input, shape index: {}]   ;;  %s1280_s7 = inlined_call_operand.vmem [shape: f32[16,128], index: 7, kind: input, shape index: {}]   ;;  %s1281_s8 = inlined_call_operand.vmem [shape: f32[16,128], index: 8, kind: output, shape index: {0}]   ;;  %s1282_s9 = inlined_call_operand.vmem [shape: f32[16,128], index: 9, kind: output, shape index: {1}]   ;;  %s1283_s10 = inlined_call_operand.vmem [shape: f32[16,128], index: 10, kind: output, shape index: {2}]  }
   0x1 LB: > { %s908_s14 = sadd.s32 4294967295, %s1071_s13   ;;  %p912_p0 = scmp.ge.s32.totalorder %s1071_s13, 1  ;;  %s1071_s13 = sphi %s1131_s13, %s21_s13  }
   0x2   : > { %p325_p1 = scmp.lt.s32.totalorder %s1071_s13, 3 }
   0x4   : > { %p326_p2 = pnand %p912_p0, %p325_p1 }
   0x5   : > { %v1023_v0 = vld [vmem:[%s1274_s1] sm:$0xff] (!%p326_p2)   ;;  %v1073_v1 = vmov (!%p326_p2), 0.0   ;;  %v1024_v2 = vld [vmem:[%s1274_s1 + $0x8] sm:$0xff] (!%p326_p2)   ;;  %vm1074_vm0 = vmmov (!%p326_p2), 0   ;;  %v1025_v3 = vld [vmem:[%s1274_s1 + $0x10] sm:$0xff] (!%p326_p2)   ;;  %p373_p3 = scmp.lt.s32.totalorder (!%p326_p2), %s908_s14, 1  ;;  %v643_v54 = vlaneseq (!%p326_p2) }
   0x6   : > { %329 = sbr.rel (%p326_p2) target bundleno = 711 (0x2c7), region = 52  ;;  %972 = vmatprep.subr.bf16.mxu0 (!%p326_p2), %v1073_v1  ;;  %992 = vmatprep.subr.bf16.mxu1 (!%p326_p2), %v1073_v1  ;;  %v1031_v4 = vld [vmem:[%s1276_s3] sm:$0xff] (!%p326_p2)   ;;  %v1026_v5 = vld [vmem:[%s1274_s1 + $0x18] sm:$0xff] (!%p326_p2)   ;;  %v1032_v6 = vld [vmem:[%s1276_s3 + $0x8] sm:$0xff] (!%p326_p2)   ;;  %v1075_v44 = vmov (!%p326_p2), 0  }
   0x7   : > { %973 = vmatpush3.bf16.msra.mxu0 (!%p326_p2), %v1023_v0  ;;  %988 = vmatprep.mubr.msk.bf16.mxu0 (!%p326_p2), %vm1074_vm0, %v1073_v1  ;;  %v1027_v7 = vld [vmem:[%s1274_s1 + $0x20] sm:$0xff] (!%p326_p2)   ;;  %v1033_v8 = vld [vmem:[%s1276_s3 + $0x10] sm:$0xff] (!%p326_p2)   ;;  %v1028_v9 = vld [vmem:[%s1274_s1 + $0x28] sm:$0xff] (!%p326_p2)   ;;  %v644_v55 = vshrl.u32 (!%p326_p2), %v643_v54, 7 }
   0x8   : > { %974 = vmatprep.subr.bf16.mxu0 (!%p326_p2), %v1073_v1  ;;  %1008 = vmatprep.mubr.msk.bf16.mxu1 (!%p326_p2), %vm1074_vm0, %v1073_v1  ;;  %v1034_v10 = vld [vmem:[%s1276_s3 + $0x18] sm:$0xff] (!%p326_p2)   ;;  %v1029_v11 = vld [vmem:[%s1274_s1 + $0x30] sm:$0xff] (!%p326_p2)   ;;  %v1035_v12 = vld [vmem:[%s1276_s3 + $0x20] sm:$0xff] (!%p326_p2)  }
   0x9   : > { %993 = vmatpush3.bf16.msra.mxu1 (!%p326_p2), %v1031_v4  ;;  %v1030_v13 = vld [vmem:[%s1274_s1 + $0x38] sm:$0xff] (!%p326_p2)   ;;  %v1036_v15 = vld [vmem:[%s1276_s3 + $0x28] sm:$0xff] (!%p326_p2)   ;;  %v1037_v17 = vld [vmem:[%s1276_s3 + $0x30] sm:$0xff] (!%p326_p2)   ;;  %v645_v56 = vsub.s32 (!%p326_p2), 0, %v644_v55  ;;  %v649_v58 = vsub.s32 (!%p326_p2), 1, %v644_v55 }
   0xa   : > { %994 = vmatprep.subr.bf16.mxu1 (!%p326_p2), %v1073_v1  ;;  %v1038_v18 = vld [vmem:[%s1276_s3 + $0x38] sm:$0xff] (!%p326_p2)   ;;  %v1039_v19 = vld [vmem:[%s1278_s5] ss:$8 sps:$4 sm:$0xff] (!%p326_p2)   ;;  %v1041_v20 = vld [vmem:[%s1278_s5 + $0x4] ss:$8 sps:$4 sm:$0xff] (!%p326_p2)  }
   0xb   : > { %975 = vmatpush3.bf16.msra.mxu0 (!%p326_p2), %v1024_v2  ;;  %v1044_v21 = vld [vmem:[%s1278_s5 + $0x14] ss:$8 sps:$4 sm:$0xff] (!%p326_p2)   ;;  %v1042_v22 = vld [vmem:[%s1278_s5 + $0x10] ss:$8 sps:$4 sm:$0xff] (!%p326_p2)   ;;  %v1047_v23 = vld [vmem:[%s1278_s5 + $0x24] ss:$8 sps:$4 sm:$0xff] (!%p326_p2)  }
   0xc   : > { %976 = vmatprep.subr.bf16.mxu0 (!%p326_p2), %v1073_v1  ;;  %v1045_v24 = vld [vmem:[%s1278_s5 + $0x20] ss:$8 sps:$4 sm:$0xff] (!%p326_p2)   ;;  %v1050_v25 = vld [vmem:[%s1278_s5 + $0x34] ss:$8 sps:$4 sm:$0xff] (!%p326_p2)   ;;  %v1048_v26 = vld [vmem:[%s1278_s5 + $0x30] ss:$8 sps:$4 sm:$0xff] (!%p326_p2)  }
   0xd   : > { %995 = vmatpush3.bf16.msra.mxu1 %v1032_v6  ;;  %s1285_s14 = smov (!%p373_p3, %s908_s14), 1  ;;  %v1053_v27 = vld [vmem:[%s1278_s5 + $0x44] ss:$8 sps:$4 sm:$0xff]   ;;  %v1051_v28 = vld [vmem:[%s1278_s5 + $0x40] ss:$8 sps:$4 sm:$0xff]  }
   0xe   : > { %996 = vmatprep.subr.bf16.mxu1 %v1073_v1  ;;  %s1173_s17 = sshll.u32 %s1285_s14, 3  ;;  %v1056_v29 = vld [vmem:[%s1278_s5 + $0x54] ss:$8 sps:$4 sm:$0xff]   ;;  %v1054_v30 = vld [vmem:[%s1278_s5 + $0x50] ss:$8 sps:$4 sm:$0xff]  }
   0xf   : > { %977 = vmatpush3.bf16.msra.mxu0 %v1025_v3  ;;  %s376_s22 = scalar_lea.vmem %s1273_s0, %s1173_s17  ;;  %v918_v31 = vld [vmem:[%s1275_s2] ss:$0 sm:$0xff]  ;;  %v1059_v40 = vld [vmem:[%s1278_s5 + $0x64] ss:$8 sps:$4 sm:$0xff]   ;;  %v1062_v42 = vld [vmem:[%s1278_s5 + $0x74] ss:$8 sps:$4 sm:$0xff]   ;;  %s384_s19 = scalar_lea.vmem %s1281_s8, %s1173_s17 }
  0x10   : > { %978 = vmatprep.subr.bf16.mxu0 %v1073_v1  ;;  %v394_v14 = vld [vmem:[%s376_s22] sm:$0xff]  ;;  %v1060_v43 = vld [vmem:[%s1278_s5 + $0x70] ss:$8 sps:$4 sm:$0xff]   ;;  %s388_s22 = scalar_lea.vmem %s1282_s9, %s1173_s17  ;;  %s380_s14 = scalar_lea.vmem %s1280_s7, %s1173_s17 }
  0x11   : > { %997 = vmatpush3.bf16.msra.mxu1 %v1033_v8  ;;  %v412_v16 = vpack.c.bf16 %v394_v14, %v394_v14  ;;  %v1057_v41 = vld [vmem:[%s1278_s5 + $0x60] ss:$8 sps:$4 sm:$0xff]   ;;  %s392_s27 = scalar_lea.vmem %s1283_s10, %s1173_s17 }
  0x12   : > { %998 = vmatprep.subr.bf16.mxu1 %v1073_v1  ;;  %v927_v45 = vld [vmem:[%s1277_s4] ss:$0 sm:$0xff] }
  0x13   : > { %979 = vmatpush3.bf16.msra.mxu0 %v1026_v5  ;;  %v639_v57 = vld [vmem:[%s1279_s6] sm:$0x3] }
  0x14   : > { %980 = vmatprep.subr.bf16.mxu0 %v1073_v1  ;;  %v646_v59 = vrot.slane %v639_v57, %v645_v56  ;;  %v650_v60 = vrot.slane %v639_v57, %v649_v58  ;;  %v640_v4 = vld [vmem:[%s380_s14] sm:$0xff] }
  0x15   : > { %999 = vmatpush3.bf16.msra.mxu1 %v1034_v10 }
  0x16   : > { %1000 = vmatprep.subr.bf16.mxu1 %v1073_v1 }
  0x17   : > { %981 = vmatpush3.bf16.msra.mxu0 %v1027_v7 }
  0x18   : > { %982 = vmatprep.subr.bf16.mxu0 %v1073_v1 }
  0x19   : > { %1001 = vmatpush3.bf16.msra.mxu1 %v1035_v12 }
  0x1a   : > { %1002 = vmatprep.subr.bf16.mxu1 %v1073_v1 }
  0x1b   : > { %983 = vmatpush3.bf16.msra.mxu0 %v1028_v9 }
  0x1c   : > { %984 = vmatprep.subr.bf16.mxu0 %v1073_v1 }
  0x1d   : > { %1003 = vmatpush3.bf16.msra.mxu1 %v1036_v15 }
  0x1e   : > { %1004 = vmatprep.subr.bf16.mxu1 %v1073_v1 }
  0x1f   : > { %985 = vmatpush3.bf16.msra.mxu0 %v1029_v11 }
  0x20   : > { %986 = vmatprep.subr.bf16.mxu0 %v1073_v1 }
  0x21   : > { %1005 = vmatpush3.bf16.msra.mxu1 %v1037_v17 }
  0x22   : > { %1006 = vmatprep.subr.bf16.mxu1 %v1073_v1 }
  0x23   : > { %987 = vmatpush3.bf16.msra.mxu0 %v1030_v13 }
  0x24   : > { %733 = vmatprep.subr.bf16.mxu0 %v1041_v20 }
  0x25   : > { %1007 = vmatpush3.bf16.msra.mxu1 %v1038_v18 }
  0x26   : > { %989 = vmatmul.mubr.bf16.vlgmr.msra.gmra.mrb[0].mxu0 %v412_v16 }
  0x27   : > { %734 = vmatpush1.bf16.msra.mxu0 %v1039_v19  ;;  %765 = vmatprep.mubr.bf16.mxu0 %v1075_v44 }
  0x28   : > { %735 = vmatprep.subr.bf16.mxu0 %v1044_v21 }
  0x2b   : > { %736 = vmatpush1.bf16.msra.mxu0 %v1042_v22 }
  0x2c   : > { %737 = vmatprep.subr.bf16.mxu0 %v1047_v23 }
  0x2f   : > { %738 = vmatpush1.bf16.msra.mxu0 %v1045_v24 }
  0x30   : > { %739 = vmatprep.subr.bf16.mxu0 %v1050_v25 }
  0x33   : > { %740 = vmatpush1.bf16.msra.mxu0 %v1048_v26 }
  0x34   : > { %741 = vmatprep.subr.bf16.mxu0 %v1053_v27 }
  0x37   : > { %742 = vmatpush1.bf16.msra.mxu0 %v1051_v28 }
  0x38   : > { %743 = vmatprep.subr.bf16.mxu0 %v1056_v29 }
  0x3b   : > { %744 = vmatpush1.bf16.msra.mxu0 %v1054_v30 }
  0x3c   : > { %745 = vmatprep.subr.bf16.mxu0 %v1059_v40 }
  0x3f   : > { %746 = vmatpush1.bf16.msra.mxu0 %v1057_v41 }
  0x40   : > { %747 = vmatprep.subr.bf16.mxu0 %v1062_v42 }
  0x43   : > { %748 = vmatpush1.bf16.msra.mxu0 %v1060_v43 }
  0xf9   : > { %v501_v32 = vpop.f32.mrb[0].mxu0 }
  0xfa   : > { %v502_v33 = vadd.f32 %v918_v31, %v501_v32  ;;  %v990_v34 = vpop.f32.mrb[1].mxu0 }
  0xfb   : > { %v504_v35 = vpop.f32.mrb[2].mxu0 }
  0xfc   : > { %v507_v36 = vmul.f32 0.2, %v502_v33  ;;  %v991_v37 = vpop.f32.mrb[3].mxu0 }
  0xfe   : > { %v508_v38 = vmax.f32 %v502_v33, %v507_v36 }
 0x100   : > { %v526_v39 = vpack.c.bf16 %v508_v38, %v508_v38 }
 0x102   : > { %1009 = vmatmul.mubr.bf16.vlgmr.msra.gmra.mrb[0].mxu1 %v526_v39 }
 0x1d5   : > { %v615_v46 = vpop.f32.mrb[0].mxu1 }
 0x1d6   : > { %v616_v47 = vadd.f32 %v927_v45, %v615_v46  ;;  %v1010_v48 = vpop.f32.mrb[1].mxu1 }
 0x1d7   : > { %v618_v49 = vpop.f32.mrb[2].mxu1 }
 0x1d8   : > { %v621_v50 = vmul.f32 0.2, %v616_v47  ;;  %v1011_v51 = vpop.f32.mrb[3].mxu1 }
 0x1da   : > { %v622_v52 = vmax.f32 %v616_v47, %v621_v50 }
 0x1dc   : > { %v641_v53 = vpack.c.bf16 %v622_v52, %v622_v52 }
 0x1de   : > { %766 = vmatmul.mubr.bf16.vlgmr.msra.gmra.mrb[4].mxu0 %v641_v53 }
 0x2b1   : > { %v767_v61 = vpop.f32.mrb[4].mxu0 }
 0x2b2   : > { %v768_v62 = vadd.f32 %v767_v61, %v646_v59  ;;  %v769_v63 = vpop.f32.mrb[5].mxu0 }
 0x2b3   : > { %v770_v0 = vadd.f32 %v769_v63, %v650_v60  ;;  %v771_v1 = vpop.f32.mrb[6].mxu0 }
 0x2b4   : > { %774 = vst [vmem:[%s384_s19] sm:$0xff] %v768_v62  ;;  %v772_v2 = vpop.f32.mrb[7].mxu0 }
 0x2b5   : > { %775 = vst [vmem:[%s388_s22] sm:$0xff] %v770_v0  ;;  %v776_v3 = vmul.f32 1.442695, %v770_v0 }
 0x2b7   : > { %1063 = vpow2.f32 %v776_v3 }
 0x2c1   : > { %v1064_v5 = vpop.eup %1063 }
 0x2c2   : > { %v778_v6 = vmul.f32 %v1064_v5, %v640_v4 }
 0x2c4   : > { %v779_v7 = vadd.f32 %v778_v6, %v768_v62 }
 0x2c6   : > { %780 = vst [vmem:[%s392_s27] sm:$0xff] %v779_v7 }
 0x2c7 PF: > { %s21_s13 = sadd.s32 1, %s1071_s13  }
 0x2c8   : > { %p18_p4 = scmp.ge.s32.totalorder %s21_s13, 4  }
 0x2ca   :  { %20 = sbr.rel (!%p18_p4) target bundleno = 1 (0x1), region = 109 }

</bundles_post_ra>
